<compile_context>
chip_gen: v5e
topology: v5e:2x2
jax: 0.10.0
libtpu: 0.0.40
codegen_flags: <defaults>
</compile_context>

<pallas_src>
import jax
import jax.numpy as jnp
from jax.experimental import pallas as pl
from jax.experimental.pallas import tpu as pltpu


def _cdiv(a, b):
    return -(-a // b)


def _ceil_to(x, m):
    return ((x + m - 1) // m) * m


def _make_kernel(true_s, ts, sc, nsc, needs_tail_mask, use_acc):
    """Build the masked-mean tile kernel.

    x_ref:   (TB, TS, TH)  input tile (edge blocks may contain garbage past S/H/B)
    m_ref:   (TB, TS)      pre-scaled mask tile (mask / sum(mask)), lane-dense
    o_ref:   (TB, TH)      output tile, resident across the S grid axis
    scratch: optional (TB, TH) f32 accumulator (only when the output is not f32)
    """

    def kernel(x_ref, m_ref, o_ref, *scratch):
        acc_ref = scratch[0] if use_acc else o_ref
        s_idx = pl.program_id(2)

        @pl.when(s_idx == 0)
        def _init():
            acc_ref[...] = jnp.zeros_like(acc_ref)

        # Chunk the S extent of the tile so the f32 cast / product temporaries
        # stay chunk-sized ((TB, sc, TH) f32) instead of full-tile.  Static
        # slices of the refs are free views; nsc is tiny (<= 8).
        for c in range(nsc):
            lo = c * sc
            x = x_ref[:, lo:lo + sc, :].astype(jnp.float32)
            m = m_ref[:, lo:lo + sc].astype(jnp.float32)
            contrib = x * m[:, :, None]
            if needs_tail_mask:
                # Mask the product (not x or m alone): edge-block garbage can be
                # NaN/inf, and 0 * NaN = NaN would poison the accumulator.
                pos = (s_idx * ts + lo
                       + jax.lax.broadcasted_iota(jnp.int32, (sc, 1), 0))
                contrib = jnp.where(pos < true_s, contrib, 0.0)
            acc_ref[...] += jnp.sum(contrib, axis=1)

        if use_acc:
            @pl.when(s_idx == pl.num_programs(2) - 1)
            def _finalize():
                o_ref[...] = acc_ref[...].astype(o_ref.dtype)

    return kernel


def global_average_pooling_1d(inputs, mask=None):
    """Masked mean over dim=1, matching PyTorch GlobalAveragePooling1D.forward.

    inputs: (B, S, H); mask: optional (B, S) (any dtype, cast to float).
    Returns (B, H).  Masked path promotes to float32 (like torch's
    `inputs * mask.float()`); unmasked path keeps the input dtype (torch.mean).
    An all-zero mask row yields nan, same as the original PyTorch module.
    """
    B, S, H = inputs.shape
    x_itemsize = jnp.dtype(inputs.dtype).itemsize

    if mask is None:
        out_dtype = inputs.dtype
        m_scaled = jnp.full((B, S), 1.0 / S, dtype=jnp.float32)
    else:
        out_dtype = jnp.result_type(inputs.dtype, jnp.float32)
        m = mask.astype(jnp.float32)
        den = jnp.sum(m, axis=1, keepdims=True)      # (B, 1), tiny XLA reduction
        m_scaled = m / den                           # fold 1/den into the mask

    use_acc = jnp.dtype(out_dtype) != jnp.dtype(jnp.float32)

    # --- Tile selection -------------------------------------------------------
    # Batch tile: 8 rows -> sublane-dense output stores; tiny B keeps full extent.
    tb = 8 if B >= 8 else B
    # x block targets ~8 MiB (tb=8, th=512): ts=512 for f32, 1024 for bf16, ...
    ts_max = 512 * max(1, 4 // x_itemsize)
    th_max = 512
    ts = S if S <= ts_max else ts_max                # mult of 8/128 or full S
    th = H if H <= th_max else th_max                # mult of 128 or full H

    nb, nh, ns = _cdiv(B, tb), _cdiv(H, th), _cdiv(S, ts)

    # v7x has 2 TensorCores and only "parallel" axes shard across them: make sure
    # the parallel sub-grid has >= 2 tiles whenever H allows a 128-aligned split.
    if nb * nh < 2 and H > 128:
        th = _ceil_to(_cdiv(H, 2), 128)
        nh = _cdiv(H, th)

    # In-kernel S sub-chunking (keeps f32 temporaries small).
    if ts > 256 and ts % 256 == 0:
        sc = 256
    elif ts > 256 and ts % 128 == 0:
        sc = 128
    else:
        sc = ts
    nsc = ts // sc
    needs_tail_mask = (S % ts) != 0

    # Only the (small) output is padded; x and the mask are never copied.
    Bp, Hp = nb * tb, nh * th

    # --- VMEM budget (double-buffered blocks + chunk temporaries + headroom) ---
    out_itemsize = jnp.dtype(out_dtype).itemsize
    x_blk = tb * ts * th * x_itemsize
    m_blk = tb * ts * 4
    o_blk = tb * th * out_itemsize
    acc_blk = tb * th * 4 if use_acc else 0
    tmp = 3 * tb * sc * th * 4
    est = 2 * (x_blk + m_blk + o_blk) + acc_blk + tmp
    vmem_limit = int(min(48 * 2**20, max(32 * 2**20, int(1.3 * est))))

    kernel = _make_kernel(S, ts, sc, nsc, needs_tail_mask, use_acc)
    scratch_shapes = [pltpu.VMEM((tb, th), jnp.float32)] if use_acc else []

    grid_spec = pltpu.PrefetchScalarGridSpec(
        num_scalar_prefetch=0,
        grid=(nb, nh, ns),                  # reduction axis last (resident acc)
        in_specs=[
            pl.BlockSpec((tb, ts, th), lambda b, h, s: (b, s, h)),
            # Mask block ignores h -> re-fetched once per H tile; extra traffic
            # is ~x_bytes/th, negligible, so the grid is not restructured.
            pl.BlockSpec((tb, ts), lambda b, h, s: (b, s)),
        ],
        out_specs=pl.BlockSpec((tb, th), lambda b, h, s: (b, h)),
        scratch_shapes=scratch_shapes,
    )

    out = pl.pallas_call(
        kernel,
        out_shape=jax.ShapeDtypeStruct((Bp, Hp), out_dtype),
        grid_spec=grid_spec,
        compiler_params=pltpu.CompilerParams(
            dimension_semantics=("parallel", "parallel", "arbitrary"),
            vmem_limit_bytes=vmem_limit,
        ),
    )(inputs, m_scaled)

    if (Bp, Hp) != (B, H):
        out = out[:B, :H]
    return out


if __name__ == "__main__":
    key = jax.random.PRNGKey(0)
    k1, k2, k3, k4 = jax.random.split(key, 4)

    # 1) Small shapes consistent with the module (single grid step path).
    B, S, H = 2, 8, 32
    x = jax.random.normal(k1, (B, S, H), dtype=jnp.float32)
    mask = jnp.array(
        [[1, 1, 1, 1, 1, 0, 0, 0],
         [1, 1, 1, 1, 1, 1, 1, 1]], dtype=jnp.int32)

    out_masked = jax.block_until_ready(global_average_pooling_1d(x, mask))
    out_mean = jax.block_until_ready(global_average_pooling_1d(x, None))
    mf = mask.astype(jnp.float32)[:, :, None]
    ref_masked = jnp.sum(x * mf, axis=1) / jnp.sum(mf, axis=1)
    ref_mean = jnp.mean(x, axis=1)
    assert out_masked.shape == (B, H) and out_mean.shape == (B, H)
    assert jnp.allclose(out_masked, ref_masked, atol=1e-5, rtol=1e-5)
    assert jnp.allclose(out_mean, ref_mean, atol=1e-5, rtol=1e-5)

    # 2) S-tiled accumulator path with an S tail handled in-kernel (no jnp.pad
    #    of x) and the H split that keeps >= 2 parallel tiles for v7x.
    B2, S2, H2 = 8, 640, 256
    x2 = jax.random.normal(k2, (B2, S2, H2), dtype=jnp.float32)
    lens = jnp.arange(1, B2 + 1) * (S2 // B2)
    mask2 = (jnp.arange(S2)[None, :] < lens[:, None]).astype(jnp.int32)
    out2 = jax.block_until_ready(global_average_pooling_1d(x2, mask2))
    mf2 = mask2.astype(jnp.float32)[:, :, None]
    ref2 = jnp.sum(x2 * mf2, axis=1) / jnp.sum(mf2, axis=1)
    assert out2.shape == (B2, H2)
    assert jnp.allclose(out2, ref2, atol=1e-5, rtol=1e-5)

    # 3) Ragged B (partial edge blocks along batch, padded output sliced off).
    B3, S3, H3 = 10, 100, 200
    x3 = jax.random.normal(k3, (B3, S3, H3), dtype=jnp.float32)
    mask3 = (jnp.arange(S3)[None, :] < (jnp.arange(B3)[:, None] * 9 + 7)).astype(jnp.int32)
    out3 = jax.block_until_ready(global_average_pooling_1d(x3, mask3))
    mf3 = mask3.astype(jnp.float32)[:, :, None]
    ref3 = jnp.sum(x3 * mf3, axis=1) / jnp.sum(mf3, axis=1)
    assert out3.shape == (B3, H3)
    assert jnp.allclose(out3, ref3, atol=1e-5, rtol=1e-5)

    # 4) bf16 unmasked path (f32 scratch accumulator + cast-on-store, H split).
    B4, S4, H4 = 4, 48, 160
    x4 = jax.random.normal(k4, (B4, S4, H4), dtype=jnp.bfloat16)
    out4 = jax.block_until_ready(global_average_pooling_1d(x4, None))
    ref4 = jnp.mean(x4.astype(jnp.float32), axis=1)
    assert out4.shape == (B4, H4) and out4.dtype == jnp.bfloat16
    assert jnp.allclose(out4.astype(jnp.float32), ref4, atol=1e-2, rtol=1e-2)

    print("KERNEL_OK")
</pallas_src>

<mosaic_0001>
module attributes {stable_mosaic.version = 11 : i64} {
  func.func @kernel(%arg0: i32, %arg1: i32, %arg2: i32, %arg3: memref<2x8x32xf32, #tpu.memory_space<vmem>>, %arg4: memref<2x8xf32, #tpu.memory_space<vmem>>, %arg5: memref<2x32xf32, #tpu.memory_space<vmem>>) attributes {dimension_semantics = [#tpu.dimension_semantics<parallel>, #tpu.dimension_semantics<parallel>, #tpu.dimension_semantics<arbitrary>], iteration_bounds = array<i64: 1, 1, 1>, scalar_prefetch = 0 : i64, scratch_operands = 0 : i64, tpu.core_type = #tpu.core_type<tc>, window_params = [{transform_indices = @transform_0, window_bounds = array<i64: 2, 8, 32>}, {transform_indices = @transform_1, window_bounds = array<i64: 2, 8>}, {transform_indices = @transform_2, window_bounds = array<i64: 2, 32>}]} {
    %c0_i32 = arith.constant 0 : i32
    %0 = arith.cmpi eq, %arg2, %c0_i32 : i32
    %1 = arith.extui %0 : i1 to i32
    %c0_i32_0 = arith.constant 0 : i32
    %2 = arith.cmpi ne, %1, %c0_i32_0 : i32
    scf.if %2 {
      %cst_9 = arith.constant 0.000000e+00 : f32
      %12 = vector.broadcast %cst_9 : f32 to vector<2x32xf32>
      %c0_10 = arith.constant 0 : index
      %c0_11 = arith.constant 0 : index
      %13 = vector.load %arg5[%c0_10, %c0_11] : memref<2x32xf32, #tpu.memory_space<vmem>>, vector<2x32xf32>
      tpu.vector_store %arg5[%c0_10, %c0_11], %12 {strides = array<i32>} : memref<2x32xf32, #tpu.memory_space<vmem>>, vector<2x32xf32>,
    } else {
    }
    %c0 = arith.constant 0 : index
    %c0_1 = arith.constant 0 : index
    %c0_2 = arith.constant 0 : index
    %3 = vector.load %arg3[%c0, %c0_1, %c0_2] : memref<2x8x32xf32, #tpu.memory_space<vmem>>, vector<2x8x32xf32>
    %c0_3 = arith.constant 0 : index
    %c0_4 = arith.constant 0 : index
    %4 = vector.load %arg4[%c0_3, %c0_4] : memref<2x8xf32, #tpu.memory_space<vmem>>, vector<2x8xf32>
    %5 = vector.shape_cast %4 : vector<2x8xf32> to vector<2x8x1xf32>
    %6 = vector.broadcast %5 : vector<2x8x1xf32> to vector<2x8x32xf32>
    %7 = arith.mulf %3, %6 : vector<2x8x32xf32>
    %c0_5 = arith.constant 0 : index
    %c0_6 = arith.constant 0 : index
    %8 = vector.load %arg5[%c0_5, %c0_6] : memref<2x32xf32, #tpu.memory_space<vmem>>, vector<2x32xf32>
    %cst = arith.constant dense<0.000000e+00> : vector<2x32xf32>
    %9 = vector.multi_reduction <add>, %7, %cst [1] : vector<2x8x32xf32> to vector<2x32xf32>
    %10 = arith.addf %8, %9 : vector<2x32xf32>
    %c0_7 = arith.constant 0 : index
    %c0_8 = arith.constant 0 : index
    %11 = vector.load %arg5[%c0_7, %c0_8] : memref<2x32xf32, #tpu.memory_space<vmem>>, vector<2x32xf32>
    tpu.vector_store %arg5[%c0_7, %c0_8], %10 {strides = array<i32>} : memref<2x32xf32, #tpu.memory_space<vmem>>, vector<2x32xf32>,
    return
  }
  func.func @transform_0(%arg0: i32, %arg1: i32, %arg2: i32) -> (i32, i32, i32) {
    %c0_i32 = arith.constant 0 : i32
    return %arg0, %arg2, %arg1 : i32, i32, i32
  }
  func.func @transform_1(%arg0: i32, %arg1: i32, %arg2: i32) -> (i32, i32) {
    %c0_i32 = arith.constant 0 : i32
    return %arg0, %arg2 : i32, i32
  }
  func.func @transform_2(%arg0: i32, %arg1: i32, %arg2: i32) -> (i32, i32) {
    %c0_i32 = arith.constant 0 : i32
    return %arg0, %arg1 : i32, i32
  }
}

</mosaic_0001>

<bundles_post_ra>
// kernel: tpu_custom_call.1
= control target key start
LH: loop header
LB: loop body
LE: loop exit
PB: predicated region body
PF: predicated region fallthrough
CT: control target
= control target key end

     0   :  { %7 = vsyncpa [#allocation3], 0  ;;  %s226_s0 = inlined_call_operand.hbm [shape: f32[2,8,32], index: 0, kind: input, shape index: {}]   ;;  %s227_s1 = inlined_call_operand.hbm [shape: f32[2,8], index: 1, kind: input, shape index: {}]   ;;  %s228_s2 = inlined_call_operand.hbm [shape: f32[2,32], index: 2, kind: output, shape index: {}]  }
   0x1   :  { %8 = vsyncpa [#allocation6], 0 }
   0x2   :  { %9 = vsyncpa [#allocation4], 0  ;;  %s14_s11 = sshll.u32 %s226_s0, 4  ;;  %s194_s12 = smov [#allocation2]   ;;  %s15_s11 = int_to_ptr.hbm [resolvable:$true] %s14_s11 }
   0x3   :  { %s16_s13 = sshll.u32 %s194_s12, 4  ;;  %s28_s16 = sshll.u32 %s227_s1, 4  ;;  %s17_s13 = int_to_ptr.vmem [resolvable:$true] %s16_s13  ;;  %s29_s16 = int_to_ptr.hbm [resolvable:$true] %s28_s16 }
   0x4   :  { %s195_s17 = smov 128   ;;  %s196_s18 = smov 8  }
   0x5   :  { %22 = dma.hbm_to_vmem [thread:$0]  %s15_s11, 256, %s17_s13, [#allocation3], %s195_s17, %s195_s17, %s196_s18  }
   0x6   :  { %s197_s19 = smov [#allocation5]  }
   0x7   :  { %s30_s20 = sshll.u32 %s197_s19, 4  ;;  %s31_s20 = int_to_ptr.vmem [resolvable:$true] %s30_s20 }
   0x8   :  { %33 = dma.hbm_to_vmem [thread:$0]  %s29_s16, 32, %s31_s20, [#allocation6]  }
   0x9   :  { %188 = dma.done.wait [#allocation3], 256  }
   0xa   :  { %189 = vsyncadd [#allocation3], 4294967040 }
   0xb   :  { %190 = dma.done.wait [#allocation6], 32  }
   0xc   :  { %191 = vsyncadd [#allocation6], 4294967264  ;;  %v52_v0 = vlaneseq  ;;  %v50_v2 = vld [vmem:[#allocation5] sm:$0x3]  ;;  %vm46_vm0 = vcmask 254976   ;;  %v198_v5 = vmov 0.0  }
   0xd   :  { %v51_v3 = vperm.slane %v50_v2, 0  ;;  %v58_v4 = vperm.slane %v50_v2, 1  ;;  %47 = vst.msk [vmem:[#allocation7] sm:$0x3] %vm46_vm0, %v198_v5  ;;  %v48_v6 = vld [vmem:[#allocation2] sm:$0xff]  ;;  %vm68_vm1 = vcmask 261120  }
   0xe   :  { %v53_v1 = vshrl.u32 %v52_v0, 7  ;;  %v49_v12 = vld [vmem:[#allocation2 + $0x8] sm:$0xff]  ;;  %vm85_vm2 = vcmask 1041409   ;;  %s199_s0 = smov [#allocation7]   ;;  %s98_s23 = sshll.u32 %s228_s2, 4  ;;  %s99_s23 = int_to_ptr.hbm [resolvable:$true] %s98_s23 }
   0xf   :  { %s96_s1 = sshll.u32 %s199_s0, 4  ;;  %s97_s1 = int_to_ptr.vmem [resolvable:$true] %s96_s1 }
  0x10   :  { %115 = vset.pattern.permute.xlu0 %v53_v1 }
  0x14   :  { %v67_v26 = vld [vmem:[#allocation7] sm:$0x3] }
  0x18   :  { %56 = vperm.xlu0 %115, %v51_v3  }
  0x20   :  { %63 = vperm.xlu0 %115, %v58_v4  }
  0x8a   :  { %v57_v7 = vpop.permute.xlu0 %56 }
  0x8b   :  { %v65_v8 = vmul.f32 %v57_v7, %v48_v6 }
  0x8d   :  { %v69_v9 = vsel %vm68_vm1, %v65_v8, 0.0 }
  0x8e   :  { %v70_v10 = vrot.slane %v69_v9, 4 }
  0x90   :  { %v71_v11 = vadd.f32 %v70_v10, %v69_v9 }
  0x92   :  { %v64_v13 = vpop.permute.xlu0 %63  ;;  %v72_v15 = vrot.slane %v71_v11, 2 }
  0x93   :  { %v66_v14 = vmul.f32 %v64_v13, %v49_v12 }
  0x94   :  { %v73_v18 = vadd.f32 %v72_v15, %v71_v11 }
  0x95   :  { %v76_v16 = vsel %vm68_vm1, %v66_v14, 0.0 }
  0x96   :  { %v77_v17 = vrot.slane %v76_v16, 4  ;;  %v74_v21 = vrot.slane %v73_v18, 1 }
  0x98   :  { %v78_v19 = vadd.f32 %v77_v17, %v76_v16  ;;  %v75_v24 = vadd.f32 %v74_v21, %v73_v18 }
  0x9a   :  { %v79_v20 = vrot.slane %v78_v19, 2 }
  0x9c   :  { %v80_v22 = vadd.f32 %v79_v20, %v78_v19 }
  0x9e   :  { %v81_v23 = vrot.slane %v80_v22, 1 }
  0xa0   :  { %v82_v25 = vadd.f32 %v81_v23, %v80_v22 }
  0xa2   :  { %v86_v27 = vsel %vm85_vm2, %v82_v25, %v75_v24 }
  0xa3   :  { %v88_v28 = vadd.f32 %v86_v27, %v67_v26 }
  0xa5   :  { %90 = vst.msk [vmem:[#allocation7] sm:$0x3] %vm46_vm0, %v88_v28 }
  0xa6   :  { %101 = dma.vmem_to_hbm [thread:$0]  %s97_s1, 32, %s99_s23, [#allocation4]  }
  0xa7   :  { %192 = dma.done.wait [#allocation4], 32  }
  0xa8   :  { %193 = vsyncadd [#allocation4], 4294967264 }
  0xa9   :  { %106 = vsyncpa [#allocation3], 1 }
  0xaa   :  { %107 = vsyncpa [#allocation6], 1 }
  0xab   :  { %108 = vsyncpa [#allocation4], 1 }

</bundles_post_ra>
